<compile_context>
chip_gen: v6e
topology: v6e:2x2x1
jax: 0.10.0
libtpu: 0.0.40
codegen_flags: <defaults>
</compile_context>

<pallas_src>
import jax
import jax.numpy as jnp
from jax.experimental import pallas as pl
from jax.experimental.pallas import tpu as pltpu


def mlp_kernel(x_ref,
               w1_ref, b1_ref,
               w2_ref, b2_ref,
               w3_ref, b3_ref,
               w4t_ref, b4_ref,
               w5t_ref, b5_ref,
               out_ref):
    """Whole forward pass for one batch tile (all weights resident in VMEM)."""
    # bf16 MXU operands, f32 accumulation; VPU math (bias/ReLU) stays f32.
    h = x_ref[...].astype(jnp.bfloat16)
    h = jnp.dot(h, w1_ref[...], preferred_element_type=jnp.float32) + b1_ref[...]
    h = jnp.maximum(h, 0.0).astype(jnp.bfloat16)                        # (bt, 128)

    h = jnp.dot(h, w2_ref[...], preferred_element_type=jnp.float32) + b2_ref[...]
    h = jnp.maximum(h, 0.0).astype(jnp.bfloat16)                        # (bt, 256)

    h = jnp.dot(h, w3_ref[...], preferred_element_type=jnp.float32) + b3_ref[...]
    h = jnp.maximum(h, 0.0).astype(jnp.bfloat16)                        # (bt, 64)

    # Tail in batch-on-lanes orientation: fc4 contracts the 64-wide feature
    # axis of both operands, so its output lands as (4, bt).  Bias/ReLU and
    # fc5 then stay lane-dense, and the (1, bt) result stores unmasked.
    h4 = jax.lax.dot_general(w4t_ref[...], h, (((1,), (1,)), ((), ())),
                             preferred_element_type=jnp.float32)        # (4, bt)
    h4 = jnp.maximum(h4 + b4_ref[...], 0.0).astype(jnp.bfloat16)        # (4, bt)

    y = jnp.dot(w5t_ref[...], h4, preferred_element_type=jnp.float32)   # (1, bt)
    out_ref[...] = jax.nn.sigmoid(y + b5_ref[...])[None]                # (1, 1, bt)


def _round_up(x, m):
    return -(-x // m) * m


_MAX_SINGLE_TILE = 2048    # single-step ceiling: per-tile VMEM ~9 MiB here
_LARGE_BATCH_TILE = 1024   # batches > 2048 rows: fixed tile, pad batch up


def _choose_tile_and_pad(batch):
    """Pick (batch_tile, padded_batch).  Never shrink the tile to divide the
    batch — pad instead.  Single grid step for batches that fit one big tile
    (best on 1-TC v5e/v6e); 1024-row tiles for larger batches (>=2 'parallel'
    steps for v7x's two TensorCores, padding waste < one tile)."""
    if batch <= _MAX_SINGLE_TILE:
        tile = _round_up(max(batch, 8), 8)     # f32 sublane multiple
        return tile, tile
    tile = _LARGE_BATCH_TILE
    return tile, _round_up(batch, tile)


def _vmem_limit_bytes(batch_tile, in_dim):
    """Scoped-VMEM estimate with lane/sublane padding (last dim rounded up to
    128 lanes, second-to-last to 8 sublanes f32 / 16 bf16).  Returns None
    (compiler default) while comfortably under the smallest default limit."""
    lp = lambda n: _round_up(n, 128)
    est = 0
    # Streamed x tile (f32) + (1, 1, bt) f32 output tile, double-buffered.
    est += 2 * _round_up(batch_tile, 8) * lp(in_dim) * 4
    est += 2 * 8 * lp(batch_tile) * 4
    # Resident bf16 weights + f32 biases (pipeline double-buffers them).
    for r, c in ((in_dim, 128), (128, 256), (256, 64), (4, 64), (1, 4)):
        est += 2 * _round_up(r, 16) * lp(c) * 2
    for r, c in ((1, 128), (1, 256), (1, 64), (4, 1), (1, 1)):
        est += 2 * _round_up(r, 8) * lp(c) * 4
    # Intermediates: f32 accumulator + bf16 operand copy for the wide layers,
    # plus the lane-dense (4, bt) / (1, bt) tail.
    for d in (128, 256, 64):
        est += _round_up(batch_tile, 8) * lp(d) * (4 + 2)
    est += 8 * lp(batch_tile) * (4 + 2)
    est += 8 * lp(batch_tile) * 4
    if est < 12 * 1024 * 1024:
        return None
    return min(int(1.5 * est), 48 * 1024 * 1024)   # headroom under v7x's 64 MiB


def mlp_forward(x, params, *, batch_tile=None):
    B, D = x.shape
    (w1, b1), (w2, b2), (w3, b3), (w4, b4), (w5, b5) = params
    assert w1.shape[0] == D

    if batch_tile is None:
        batch_tile, padded_b = _choose_tile_and_pad(B)
    else:
        padded_b = _round_up(B, batch_tile)
    assert batch_tile == padded_b or batch_tile % 8 == 0, (
        "batch_tile < padded batch must be a multiple of 8 (f32 sublane tiling)")
    num_tiles = padded_b // batch_tile

    if padded_b != B:
        x = jnp.pad(x, ((0, padded_b - B), (0, 0)))   # zero rows, sliced off below

    # bf16 weights for the MXU; biases stay f32 (added to the f32 accumulator).
    w1b = w1.astype(jnp.bfloat16)                 # (D, 128)
    w2b = w2.astype(jnp.bfloat16)                 # (128, 256)
    w3b = w3.astype(jnp.bfloat16)                 # (256, 64)
    w4t = w4.T.astype(jnp.bfloat16)               # (4, 64)  PyTorch (out, in) layout
    w5t = w5.T.astype(jnp.bfloat16)               # (1, 4)
    b1r = b1.reshape(1, -1)
    b2r = b2.reshape(1, -1)
    b3r = b3.reshape(1, -1)
    b4c = b4.reshape(-1, 1)                       # (4, 1): column bias for (4, bt)
    b5c = b5.reshape(1, 1)

    operands = [w1b, b1r, w2b, b2r, w3b, b3r, w4t, b4c, w5t, b5c]

    def resident_map(i):
        return (0, 0)      # weights/biases: same block every step (stay in VMEM)

    in_specs = [pl.BlockSpec((batch_tile, D), lambda i: (i, 0))]
    in_specs += [pl.BlockSpec(op.shape, resident_map) for op in operands]

    # Lane-dense output: one (1, 1, batch_tile) slab per grid step.
    out_spec = pl.BlockSpec((1, 1, batch_tile), lambda i: (i, 0, 0))

    out = pl.pallas_call(
        mlp_kernel,
        out_shape=jax.ShapeDtypeStruct((num_tiles, 1, batch_tile), jnp.float32),
        grid_spec=pltpu.PrefetchScalarGridSpec(
            num_scalar_prefetch=0,
            grid=(num_tiles,),
            in_specs=in_specs,
            out_specs=out_spec,
        ),
        compiler_params=pltpu.CompilerParams(
            dimension_semantics=("parallel",),
            vmem_limit_bytes=_vmem_limit_bytes(batch_tile, D),
        ),
    )(x, *operands)

    return out.reshape(padded_b, 1)[:B]


def init_params(key, input_shape):
    """nn.Linear-style init: U(-1/sqrt(fan_in), 1/sqrt(fan_in)) for W and b.
    Weights stored as (in, out); layer 5 is (4, 1)."""
    dims = [input_shape, 128, 256, 64, 4, 1]
    params = []
    for fan_in, fan_out in zip(dims[:-1], dims[1:]):
        key, kw, kb = jax.random.split(key, 3)
        bound = 1.0 / jnp.sqrt(jnp.float32(fan_in))
        w = jax.random.uniform(kw, (fan_in, fan_out), jnp.float32, -bound, bound)
        b = jax.random.uniform(kb, (1, fan_out), jnp.float32, -bound, bound)
        params.append((w, b))
    return params


def mlp_reference(x, params):
    """Pure-JAX reference mirroring the kernel's precision recipe:
    bf16-rounded weights/activation operands, f32 accumulation/ReLU/sigmoid."""
    h = x
    n = len(params)
    for i, (w, b) in enumerate(params):
        wq = w.astype(jnp.bfloat16).astype(jnp.float32)
        hq = h.astype(jnp.bfloat16).astype(jnp.float32)
        h = hq @ wq + b
        if i < n - 1:
            h = jnp.maximum(h, 0.0)
    return jax.nn.sigmoid(h)


if __name__ == "__main__":
    key = jax.random.PRNGKey(0)
    k_params, k1, k2, k3 = jax.random.split(key, 4)

    input_shape = 32
    params = init_params(k_params, input_shape)

    # 1) Tiny batch: single grid step, block == full (padded) batch.
    x_small = jax.random.normal(k1, (8, input_shape), jnp.float32)
    out_small = jax.block_until_ready(mlp_forward(x_small, params))
    ref_small = mlp_reference(x_small, params)
    assert out_small.shape == (8, 1)
    assert jnp.allclose(out_small, ref_small, atol=2e-3, rtol=2e-3)

    # 2) Non-multiple-of-8 batch: exercises the zero-pad + slice path (no tiny
    #    tile fallback), still a single grid step.
    x_odd = jax.random.normal(k2, (100, input_shape), jnp.float32)
    out_odd = jax.block_until_ready(mlp_forward(x_odd, params))
    ref_odd = mlp_reference(x_odd, params)
    assert out_odd.shape == (100, 1)
    assert jnp.allclose(out_odd, ref_odd, atol=2e-3, rtol=2e-3)

    # 3) Explicit multi-tile case: 300 rows padded to 384, grid=(3,) "parallel"
    #    (exercises MXU-sized tiles, lane-dense output slabs, megacore path).
    x_multi = jax.random.normal(k3, (300, input_shape), jnp.float32)
    out_multi = jax.block_until_ready(mlp_forward(x_multi, params, batch_tile=128))
    ref_multi = mlp_reference(x_multi, params)
    assert out_multi.shape == (300, 1)
    assert jnp.allclose(out_multi, ref_multi, atol=2e-3, rtol=2e-3)

    print("KERNEL_OK")
</pallas_src>

<mosaic_0001>
module attributes {stable_mosaic.version = 11 : i64} {
  func.func @mlp_kernel(%arg0: i32, %arg1: memref<8x32xf32, #tpu.memory_space<vmem>>, %arg2: memref<32x128xbf16, #tpu.memory_space<vmem>>, %arg3: memref<1x128xf32, #tpu.memory_space<vmem>>, %arg4: memref<128x256xbf16, #tpu.memory_space<vmem>>, %arg5: memref<1x256xf32, #tpu.memory_space<vmem>>, %arg6: memref<256x64xbf16, #tpu.memory_space<vmem>>, %arg7: memref<1x64xf32, #tpu.memory_space<vmem>>, %arg8: memref<4x64xbf16, #tpu.memory_space<vmem>>, %arg9: memref<4x1xf32, #tpu.memory_space<vmem>>, %arg10: memref<1x4xbf16, #tpu.memory_space<vmem>>, %arg11: memref<1x1xf32, #tpu.memory_space<vmem>>, %arg12: memref<1x1x8xf32, #tpu.memory_space<vmem>>) attributes {dimension_semantics = [#tpu.dimension_semantics<parallel>], iteration_bounds = array<i64: 1>, scalar_prefetch = 0 : i64, scratch_operands = 0 : i64, tpu.core_type = #tpu.core_type<tc>, window_params = [{transform_indices = @transform_0, window_bounds = array<i64: 8, 32>}, {pipeline_mode = #tpu.pipeline_mode<synchronous>, transform_indices = @transform_1, window_bounds = array<i64: 32, 128>}, {pipeline_mode = #tpu.pipeline_mode<synchronous>, transform_indices = @transform_2, window_bounds = array<i64: 1, 128>}, {pipeline_mode = #tpu.pipeline_mode<synchronous>, transform_indices = @transform_3, window_bounds = array<i64: 128, 256>}, {pipeline_mode = #tpu.pipeline_mode<synchronous>, transform_indices = @transform_4, window_bounds = array<i64: 1, 256>}, {pipeline_mode = #tpu.pipeline_mode<synchronous>, transform_indices = @transform_5, window_bounds = array<i64: 256, 64>}, {pipeline_mode = #tpu.pipeline_mode<synchronous>, transform_indices = @transform_6, window_bounds = array<i64: 1, 64>}, {pipeline_mode = #tpu.pipeline_mode<synchronous>, transform_indices = @transform_7, window_bounds = array<i64: 4, 64>}, {pipeline_mode = #tpu.pipeline_mode<synchronous>, transform_indices = @transform_8, window_bounds = array<i64: 4, 1>}, {pipeline_mode = #tpu.pipeline_mode<synchronous>, transform_indices = @transform_9, window_bounds = array<i64: 1, 4>}, {pipeline_mode = #tpu.pipeline_mode<synchronous>, transform_indices = @transform_10, window_bounds = array<i64: 1, 1>}, {transform_indices = @transform_11, window_bounds = array<i64: 1, 1, 8>}]} {
    %c0 = arith.constant 0 : index
    %c0_0 = arith.constant 0 : index
    %0 = vector.load %arg1[%c0, %c0_0] : memref<8x32xf32, #tpu.memory_space<vmem>>, vector<8x32xf32>
    %1 = arith.truncf %0 : vector<8x32xf32> to vector<8x32xbf16>
    %c0_1 = arith.constant 0 : index
    %c0_2 = arith.constant 0 : index
    %2 = vector.load %arg2[%c0_1, %c0_2] : memref<32x128xbf16, #tpu.memory_space<vmem>>, vector<32x128xbf16>
    %cst = arith.constant dense<0.000000e+00> : vector<8x128xf32>
    %3 = tpu.matmul %1, %2, %cst {dimension_numbers = #tpu.dot_dimension_numbers<[1], [0], [0], [1], [0, 0, 1, 1], [], []>} : vector<8x32xbf16>, vector<32x128xbf16>, vector<8x128xf32> -> vector<8x128xf32>
    %c0_3 = arith.constant 0 : index
    %c0_4 = arith.constant 0 : index
    %4 = vector.load %arg3[%c0_3, %c0_4] : memref<1x128xf32, #tpu.memory_space<vmem>>, vector<1x128xf32>
    %5 = vector.broadcast %4 : vector<1x128xf32> to vector<8x128xf32>
    %6 = arith.addf %3, %5 : vector<8x128xf32>
    %cst_5 = arith.constant 0.000000e+00 : f32
    %7 = vector.broadcast %cst_5 : f32 to vector<8x128xf32>
    %8 = arith.maximumf %6, %7 : vector<8x128xf32>
    %9 = arith.truncf %8 : vector<8x128xf32> to vector<8x128xbf16>
    %c0_6 = arith.constant 0 : index
    %c0_7 = arith.constant 0 : index
    %10 = vector.load %arg4[%c0_6, %c0_7] : memref<128x256xbf16, #tpu.memory_space<vmem>>, vector<128x256xbf16>
    %cst_8 = arith.constant dense<0.000000e+00> : vector<8x256xf32>
    %11 = tpu.matmul %9, %10, %cst_8 {dimension_numbers = #tpu.dot_dimension_numbers<[1], [0], [0], [1], [0, 0, 1, 1], [], []>} : vector<8x128xbf16>, vector<128x256xbf16>, vector<8x256xf32> -> vector<8x256xf32>
    %c0_9 = arith.constant 0 : index
    %c0_10 = arith.constant 0 : index
    %12 = vector.load %arg5[%c0_9, %c0_10] : memref<1x256xf32, #tpu.memory_space<vmem>>, vector<1x256xf32>
    %13 = vector.broadcast %12 : vector<1x256xf32> to vector<8x256xf32>
    %14 = arith.addf %11, %13 : vector<8x256xf32>
    %cst_11 = arith.constant 0.000000e+00 : f32
    %15 = vector.broadcast %cst_11 : f32 to vector<8x256xf32>
    %16 = arith.maximumf %14, %15 : vector<8x256xf32>
    %17 = arith.truncf %16 : vector<8x256xf32> to vector<8x256xbf16>
    %c0_12 = arith.constant 0 : index
    %c0_13 = arith.constant 0 : index
    %18 = vector.load %arg6[%c0_12, %c0_13] : memref<256x64xbf16, #tpu.memory_space<vmem>>, vector<256x64xbf16>
    %cst_14 = arith.constant dense<0.000000e+00> : vector<8x64xf32>
    %19 = tpu.matmul %17, %18, %cst_14 {dimension_numbers = #tpu.dot_dimension_numbers<[1], [0], [0], [1], [0, 0, 1, 1], [], []>} : vector<8x256xbf16>, vector<256x64xbf16>, vector<8x64xf32> -> vector<8x64xf32>
    %c0_15 = arith.constant 0 : index
    %c0_16 = arith.constant 0 : index
    %20 = vector.load %arg7[%c0_15, %c0_16] : memref<1x64xf32, #tpu.memory_space<vmem>>, vector<1x64xf32>
    %21 = vector.broadcast %20 : vector<1x64xf32> to vector<8x64xf32>
    %22 = arith.addf %19, %21 : vector<8x64xf32>
    %cst_17 = arith.constant 0.000000e+00 : f32
    %23 = vector.broadcast %cst_17 : f32 to vector<8x64xf32>
    %24 = arith.maximumf %22, %23 : vector<8x64xf32>
    %25 = arith.truncf %24 : vector<8x64xf32> to vector<8x64xbf16>
    %c0_18 = arith.constant 0 : index
    %c0_19 = arith.constant 0 : index
    %26 = vector.load %arg8[%c0_18, %c0_19] : memref<4x64xbf16, #tpu.memory_space<vmem>>, vector<4x64xbf16>
    %cst_20 = arith.constant dense<0.000000e+00> : vector<4x8xf32>
    %27 = tpu.matmul %26, %25, %cst_20 {dimension_numbers = #tpu.dot_dimension_numbers<[1], [1], [0], [0], [0, 0, 1, 0], [], []>} : vector<4x64xbf16>, vector<8x64xbf16>, vector<4x8xf32> -> vector<4x8xf32>
    %c0_21 = arith.constant 0 : index
    %c0_22 = arith.constant 0 : index
    %28 = vector.load %arg9[%c0_21, %c0_22] : memref<4x1xf32, #tpu.memory_space<vmem>>, vector<4x1xf32>
    %29 = vector.broadcast %28 : vector<4x1xf32> to vector<4x8xf32>
    %30 = arith.addf %27, %29 : vector<4x8xf32>
    %cst_23 = arith.constant 0.000000e+00 : f32
    %31 = vector.broadcast %cst_23 : f32 to vector<4x8xf32>
    %32 = arith.maximumf %30, %31 : vector<4x8xf32>
    %33 = arith.truncf %32 : vector<4x8xf32> to vector<4x8xbf16>
    %c0_24 = arith.constant 0 : index
    %c0_25 = arith.constant 0 : index
    %34 = vector.load %arg10[%c0_24, %c0_25] : memref<1x4xbf16, #tpu.memory_space<vmem>>, vector<1x4xbf16>
    %cst_26 = arith.constant dense<0.000000e+00> : vector<1x8xf32>
    %35 = tpu.matmul %34, %33, %cst_26 {dimension_numbers = #tpu.dot_dimension_numbers<[1], [0], [0], [1], [0, 0, 1, 1], [], []>} : vector<1x4xbf16>, vector<4x8xbf16>, vector<1x8xf32> -> vector<1x8xf32>
    %c0_27 = arith.constant 0 : index
    %c0_28 = arith.constant 0 : index
    %36 = vector.load %arg11[%c0_27, %c0_28] : memref<1x1xf32, #tpu.memory_space<vmem>>, vector<1x1xf32>
    %37 = vector.broadcast %36 : vector<1x1xf32> to vector<1x8xf32>
    %38 = arith.addf %35, %37 : vector<1x8xf32>
    %39 = arith.negf %38 : vector<1x8xf32>
    %40 = math.exp %39 : vector<1x8xf32>
    %cst_29 = arith.constant 1.000000e+00 : f32
    %41 = vector.broadcast %cst_29 : f32 to vector<1x8xf32>
    %42 = arith.addf %41, %40 : vector<1x8xf32>
    %43 = arith.divf %41, %42 : vector<1x8xf32>
    %44 = vector.shape_cast %43 : vector<1x8xf32> to vector<1x1x8xf32>
    %c0_30 = arith.constant 0 : index
    %c0_31 = arith.constant 0 : index
    %c0_32 = arith.constant 0 : index
    %45 = vector.load %arg12[%c0_30, %c0_31, %c0_32] : memref<1x1x8xf32, #tpu.memory_space<vmem>>, vector<1x1x8xf32>
    tpu.vector_store %arg12[%c0_30, %c0_31, %c0_32], %44 {strides = array<i32>} : memref<1x1x8xf32, #tpu.memory_space<vmem>>, vector<1x1x8xf32>,
    return
  }
  func.func @transform_0(%arg0: i32) -> (i32, i32) {
    %c0_i32 = arith.constant 0 : i32
    %c0_i32_0 = arith.constant 0 : i32
    return %arg0, %c0_i32 : i32, i32
  }
  func.func @transform_1(%arg0: i32) -> (i32, i32) {
    %c0_i32 = arith.constant 0 : i32
    %c0_i32_0 = arith.constant 0 : i32
    %c0_i32_1 = arith.constant 0 : i32
    return %c0_i32, %c0_i32_0 : i32, i32
  }
  func.func @transform_2(%arg0: i32) -> (i32, i32) {
    %c0_i32 = arith.constant 0 : i32
    %c0_i32_0 = arith.constant 0 : i32
    %c0_i32_1 = arith.constant 0 : i32
    return %c0_i32, %c0_i32_0 : i32, i32
  }
  func.func @transform_3(%arg0: i32) -> (i32, i32) {
    %c0_i32 = arith.constant 0 : i32
    %c0_i32_0 = arith.constant 0 : i32
    %c0_i32_1 = arith.constant 0 : i32
    return %c0_i32, %c0_i32_0 : i32, i32
  }
  func.func @transform_4(%arg0: i32) -> (i32, i32) {
    %c0_i32 = arith.constant 0 : i32
    %c0_i32_0 = arith.constant 0 : i32
    %c0_i32_1 = arith.constant 0 : i32
    return %c0_i32, %c0_i32_0 : i32, i32
  }
  func.func @transform_5(%arg0: i32) -> (i32, i32) {
    %c0_i32 = arith.constant 0 : i32
    %c0_i32_0 = arith.constant 0 : i32
    %c0_i32_1 = arith.constant 0 : i32
    return %c0_i32, %c0_i32_0 : i32, i32
  }
  func.func @transform_6(%arg0: i32) -> (i32, i32) {
    %c0_i32 = arith.constant 0 : i32
    %c0_i32_0 = arith.constant 0 : i32
    %c0_i32_1 = arith.constant 0 : i32
    return %c0_i32, %c0_i32_0 : i32, i32
  }
  func.func @transform_7(%arg0: i32) -> (i32, i32) {
    %c0_i32 = arith.constant 0 : i32
    %c0_i32_0 = arith.constant 0 : i32
    %c0_i32_1 = arith.constant 0 : i32
    return %c0_i32, %c0_i32_0 : i32, i32
  }
  func.func @transform_8(%arg0: i32) -> (i32, i32) {
    %c0_i32 = arith.constant 0 : i32
    %c0_i32_0 = arith.constant 0 : i32
    %c0_i32_1 = arith.constant 0 : i32
    return %c0_i32, %c0_i32_0 : i32, i32
  }
  func.func @transform_9(%arg0: i32) -> (i32, i32) {
    %c0_i32 = arith.constant 0 : i32
    %c0_i32_0 = arith.constant 0 : i32
    %c0_i32_1 = arith.constant 0 : i32
    return %c0_i32, %c0_i32_0 : i32, i32
  }
  func.func @transform_10(%arg0: i32) -> (i32, i32) {
    %c0_i32 = arith.constant 0 : i32
    %c0_i32_0 = arith.constant 0 : i32
    %c0_i32_1 = arith.constant 0 : i32
    return %c0_i32, %c0_i32_0 : i32, i32
  }
  func.func @transform_11(%arg0: i32) -> (i32, i32, i32) {
    %c0_i32 = arith.constant 0 : i32
    %c0_i32_0 = arith.constant 0 : i32
    %c0_i32_1 = arith.constant 0 : i32
    return %arg0, %c0_i32, %c0_i32_0 : i32, i32, i32
  }
}

</mosaic_0001>

<bundles_post_ra>
// kernel: tpu_custom_call.1
= control target key start
LH: loop header
LB: loop body
LE: loop exit
PB: predicated region body
PF: predicated region fallthrough
CT: control target
= control target key end

     0   :  { %s945_s0 = inlined_call_operand.vmem [shape: f32[8,32], index: 0, kind: input, shape index: {}]   ;;  %s946_s1 = inlined_call_operand.vmem [shape: bf16[32,128], index: 1, kind: input, shape index: {}]   ;;  %s947_s2 = inlined_call_operand.vmem [shape: f32[1,128], index: 2, kind: input, shape index: {}]   ;;  %s948_s3 = inlined_call_operand.vmem [shape: bf16[128,256], index: 3, kind: input, shape index: {}]   ;;  %s949_s4 = inlined_call_operand.vmem [shape: f32[1,256], index: 4, kind: input, shape index: {}]   ;;  %s950_s5 = inlined_call_operand.vmem [shape: bf16[256,64], index: 5, kind: input, shape index: {}]   ;;  %s951_s6 = inlined_call_operand.vmem [shape: f32[1,64], index: 6, kind: input, shape index: {}]   ;;  %s952_s7 = inlined_call_operand.vmem [shape: bf16[4,64], index: 7, kind: input, shape index: {}]   ;;  %s953_s8 = inlined_call_operand.vmem [shape: f32[4,1], index: 8, kind: input, shape index: {}]   ;;  %s954_s9 = inlined_call_operand.vmem [shape: bf16[1,4], index: 9, kind: input, shape index: {}]   ;;  %s955_s10 = inlined_call_operand.<no memory space> [shape: f32[1,1], index: 10, kind: input, shape index: {}]   ;;  %s956_s11 = inlined_call_operand.hbm [shape: f32[1,1,8], index: 11, kind: output, shape index: {}]  }
   0x1   :  { %v16_v0 = vstv %s955_s10 }
   0x2   :  { %17 = vst [vmem:[#allocation2] sm:$0x1] %v16_v0 }
   0x3   :  { %v674_v1 = vld [vmem:[%s946_s1 + $0x8] sm:$0xff]   ;;  %v742_v2 = vmov 0.0   ;;  %v675_v3 = vld [vmem:[%s946_s1] sm:$0xff]   ;;  %vm743_vm0 = vmmov 0   ;;  %v676_v5 = vld [vmem:[%s948_s3 + $0x74] ss:$8 sps:$4 sm:$0xff]  }
   0x4   :  { %649 = vmatprep.subr.bf16.mxu0 %v742_v2  ;;  %653 = vmatprep.mubr.msk.bf16.mxu0 %vm743_vm0, %v742_v2  ;;  %v42_v4 = vld [vmem:[%s945_s0] sm:$0xff]  ;;  %v678_v6 = vld [vmem:[%s948_s3 + $0x70] ss:$8 sps:$4 sm:$0xff]   ;;  %vm67_vm1 = vcmask 261120   ;;  %v682_v10 = vld [vmem:[%s948_s3 + $0x54] ss:$8 sps:$4 sm:$0xff]  }
   0x5   :  { %650 = vmatpush3.bf16.msra.mxu0 %v674_v1  ;;  %v679_v7 = vld [vmem:[%s948_s3 + $0x64] ss:$8 sps:$4 sm:$0xff]   ;;  %v43_v8 = vpack.c.bf16 %v42_v4, %v42_v4  ;;  %221 = vmatprep.subr.bf16.mxu1 %v676_v5  ;;  %v681_v9 = vld [vmem:[%s948_s3 + $0x60] ss:$8 sps:$4 sm:$0xff]   ;;  %v684_v11 = vld [vmem:[%s948_s3 + $0x50] ss:$8 sps:$4 sm:$0xff]  }
   0x6   :  { %651 = vmatprep.subr.bf16.mxu0 %v742_v2  ;;  %222 = vmatpush1.bf16.msra.mxu1 %v678_v6  ;;  %v685_v12 = vld [vmem:[%s948_s3 + $0x44] ss:$8 sps:$4 sm:$0xff]   ;;  %v687_v13 = vld [vmem:[%s948_s3 + $0x40] ss:$8 sps:$4 sm:$0xff]   ;;  %v688_v14 = vld [vmem:[%s948_s3 + $0x34] ss:$8 sps:$4 sm:$0xff]  }
   0x7   :  { %223 = vmatprep.subr.bf16.mxu1 %v679_v7  ;;  %v690_v15 = vld [vmem:[%s948_s3 + $0x30] ss:$8 sps:$4 sm:$0xff]   ;;  %v691_v16 = vld [vmem:[%s948_s3 + $0x24] ss:$8 sps:$4 sm:$0xff]   ;;  %v693_v17 = vld [vmem:[%s948_s3 + $0x20] ss:$8 sps:$4 sm:$0xff]  }
   0x8   :  { %v694_v18 = vld [vmem:[%s948_s3 + $0x14] ss:$8 sps:$4 sm:$0xff]  }
   0x9   :  { %652 = vmatpush3.bf16.msra.mxu0 %v675_v3 }
   0xa   :  { %224 = vmatpush1.bf16.msra.mxu1 %v681_v9 }
   0xb   :  { %225 = vmatprep.subr.bf16.mxu1 %v682_v10 }
   0xc   :  { %654 = vmatmul.mubr.msk.bf16.vlgmr.msra.gmra.mxu0 %vm67_vm1, %v43_v8 }
   0xe   :  { %226 = vmatpush1.bf16.msra.mxu1 %v684_v11 }
   0xf   :  { %227 = vmatprep.subr.bf16.mxu1 %v685_v12 }
  0x12   :  { %228 = vmatpush1.bf16.msra.mxu1 %v687_v13 }
  0x13   :  { %229 = vmatprep.subr.bf16.mxu1 %v688_v14 }
  0x16   :  { %230 = vmatpush1.bf16.msra.mxu1 %v690_v15 }
  0x17   :  { %231 = vmatprep.subr.bf16.mxu1 %v691_v16 }
  0x18   :  { %18 = vsyncpa [#allocation4], 0  ;;  %v696_v19 = vld [vmem:[%s948_s3 + $0x10] ss:$8 sps:$4 sm:$0xff]   ;;  %v697_v20 = vld [vmem:[%s948_s3 + $0x4] ss:$8 sps:$4 sm:$0xff]   ;;  %v131_v47 = vlaneseq }
  0x19   :  { %v699_v21 = vld [vmem:[%s948_s3] ss:$8 sps:$4 sm:$0xff]   ;;  %v744_v22 = vmov 0   ;;  %v700_v23 = vld [vmem:[%s950_s5 + $0x78] sm:$0xff]   ;;  %v702_v25 = vld [vmem:[%s950_s5 + $0x70] sm:$0xff]   ;;  %vm450_vm2 = vcmask 523264  }
  0x1a   :  { %232 = vmatpush1.bf16.msra.mxu1 %v693_v17  ;;  %253 = vmatprep.mubr.bf16.mxu1 %v744_v22  ;;  %v701_v24 = vld [vmem:[%s950_s5 + $0x38] sm:$0xff]   ;;  %v703_v26 = vld [vmem:[%s950_s5 + $0x30] sm:$0xff]   ;;  %v704_v27 = vld [vmem:[%s950_s5 + $0x68] sm:$0xff]   ;;  %v132_v48 = vshrl.u32 %v131_v47, 7  ;;  %vm514_vm3 = vcmask 1041408   ;;  %vm510_vm4 = vcmask 31744  }
  0x1b   :  { %233 = vmatprep.subr.bf16.mxu1 %v694_v18  ;;  %673 = vset.pattern.permute.xlu0 %v744_v22  ;;  %v705_v28 = vld [vmem:[%s950_s5 + $0x28] sm:$0xff]   ;;  %v706_v29 = vld [vmem:[%s950_s5 + $0x60] sm:$0xff]   ;;  %v708_v31 = vld [vmem:[%s950_s5 + $0x58] sm:$0xff]   ;;  %vm564_vm5 = vcmask 57344  }
  0x1c   :  { %623 = vmatprep.subr.bf16.mxu0 %v700_v23  ;;  %v707_v30 = vld [vmem:[%s950_s5 + $0x20] sm:$0xff]   ;;  %v709_v32 = vld [vmem:[%s950_s5 + $0x18] sm:$0xff]   ;;  %v710_v33 = vld [vmem:[%s950_s5 + $0x50] sm:$0xff]   ;;  %v133_v49 = vsub.s32 0, %v132_v48  ;;  %v137_v51 = vsub.s32 1, %v132_v48 }
  0x1d   :  { %624 = vmatpush3.bf16.msra.mxu0 %v701_v24  ;;  %v711_v34 = vld [vmem:[%s950_s5 + $0x10] sm:$0xff]   ;;  %v580_v35 = vld [vmem:[%s947_s2] ss:$0 sm:$0xff]  ;;  %v712_v43 = vld [vmem:[%s950_s5 + $0x48] sm:$0xff]  }
  0x1e   :  { %234 = vmatpush1.bf16.msra.mxu1 %v696_v19  ;;  %625 = vmatprep.subr.bf16.mxu0 %v702_v25  ;;  %v713_v44 = vld [vmem:[%s950_s5 + $0x8] sm:$0xff]   ;;  %v714_v45 = vld [vmem:[%s950_s5 + $0x40] sm:$0xff]  }
  0x1f   :  { %235 = vmatprep.subr.bf16.mxu1 %v697_v20  ;;  %v715_v46 = vld [vmem:[%s950_s5] sm:$0xff]  }
  0x20   :  { %v129_v50 = vld [vmem:[%s949_s4] sm:$0x3] }
  0x21   :  { %626 = vmatpush3.bf16.msra.mxu0 %v703_v26  ;;  %v134_v52 = vrot.slane %v129_v50, %v133_v49  ;;  %v138_v53 = vrot.slane %v129_v50, %v137_v51  ;;  %v444_v0 = vld [vmem:[%s953_s8] sm:$0xf] }
  0x22   :  { %236 = vmatpush1.bf16.msra.mxu1 %v699_v21  ;;  %627 = vmatprep.subr.bf16.mxu0 %v704_v27  ;;  %v500_v1 = vld [vmem:[#allocation2] sm:$0x1] }
  0x23   :  { %657 = vmatprep.subr.bf16.mxu1 %v742_v2  ;;  %447 = vperm.xlu0 %673, %v444_v0   ;;  %v600_v4 = vld [vmem:[%s951_s6] ss:$0 sm:$0xff] }
  0x24   :  { %v443_v12 = vld [vmem:[%s952_s7] sm:$0x3]  ;;  %s745_s7 = smov [#allocation3]  }
  0x25   :  { %628 = vmatpush3.bf16.msra.mxu0 %v705_v28  ;;  %v499_v22 = vld [vmem:[%s954_s9] sm:$0x1]  ;;  %s572_s27 = sshll.u32 %s745_s7, 4  ;;  %s573_s27 = int_to_ptr.vmem [resolvable:$true] %s572_s27 }
  0x26   :  { %629 = vmatprep.subr.bf16.mxu0 %v706_v29  ;;  %s720_s9 = scalar_lea.vmem %s573_s27, 16  ;;  %s724_s1 = scalar_lea.vmem %s573_s27, 32 }
  0x27   :  { %503 = vperm.xlu0 %673, %v500_v1   ;;  %p721_p0 = scmp.ne.s32.totalorder %s573_s27, %s720_s9  ;;  %p725_p1 = scmp.lt.s32.totalorder %s573_s27, %s573_s27 }
  0x28   :  { %p726_p2 = scmp.lt.s32.totalorder %s724_s1, %s720_s9 }
  0x29   :  { %630 = vmatpush3.bf16.msra.mxu0 %v707_v30 }
  0x2a   :  { %631 = vmatprep.subr.bf16.mxu0 %v708_v31  ;;  %p727_p3 = por %p726_p2, %p725_p1 }
  0x2c   :  { %p728_p4 = pnand %p727_p3, %p721_p0 }
  0x2d   :  { %632 = vmatpush3.bf16.msra.mxu0 %v709_v32 }
  0x2e   :  { %633 = vmatprep.subr.bf16.mxu0 %v710_v33 }
  0x31   :  { %634 = vmatpush3.bf16.msra.mxu0 %v711_v34 }
  0x32   :  { %635 = vmatprep.subr.bf16.mxu0 %v712_v43 }
  0x35   :  { %636 = vmatpush3.bf16.msra.mxu0 %v713_v44 }
  0x36   :  { %637 = vmatprep.subr.bf16.mxu0 %v714_v45 }
  0x39   :  { %638 = vmatpush3.bf16.msra.mxu0 %v715_v46 }
  0x3a   :  { %663 = vmatprep.subr.bf16.mxu0 %v742_v2 }
  0x9e   :  { %v448_v13 = vpop.permute.xlu0 %447 }
  0xa2   :  { %v504_v23 = vpop.permute.xlu0 %503 }
  0xa3   :  { %v509_v24 = vrot.slane %v504_v23, %v133_v49 }
  0xcc   :  { %v105_v36 = vpop.f32.mrf.mxu0 }
  0xcd   :  { %v106_v37 = vadd.f32 %v580_v35, %v105_v36 }
  0xce   :  { %v655_v38 = vpop.f32.mrf.mxu0 }
  0xcf   :  { %v111_v39 = vmax.f32 %v106_v37, 0.0 }
  0xd0   :  { %v108_v40 = vpop.f32.mrf.mxu0 }
  0xd1   :  { %v112_v41 = vpack.c.bf16 %v111_v39, %v111_v39 }
  0xd2   :  { %v656_v42 = vpop.f32.mrf.mxu0 }
  0xd3   :  { %254 = vmatmul.mubr.bf16.vlgmr.msra.gmra.mxu1 %v112_v41 }
  0xd4   :  { %659 = vmatprep.mubr.msk.bf16.mxu1 %vm743_vm0, %v742_v2 }
 0x193   :  { %v255_v54 = vpop.f32.mrf.mxu1 }
 0x194   :  { %v256_v55 = vadd.f32 %v255_v54, %v134_v52 }
 0x195   :  { %v257_v56 = vpop.f32.mrf.mxu1 }
 0x196   :  { %v258_v57 = vadd.f32 %v257_v56, %v138_v53  ;;  %v262_v58 = vmax.f32 %v256_v55, 0.0 }
 0x197   :  { %v259_v59 = vpop.f32.mrf.mxu1 }
 0x198   :  { %v263_v60 = vmax.f32 %v258_v57, 0.0  ;;  %v264_v63 = vpack.c.bf16 %v262_v58, %v262_v58 }
 0x199   :  { %v260_v61 = vpop.f32.mrf.mxu1 }
 0x19a   :  { %v265_v62 = vpack.c.bf16 %v263_v60, %v263_v60 }
 0x19c   :  { %433 = vmatprep.mubr.bf16.mxu0 %v265_v62 }
 0x19d   :  { %434 = vmatmul.mubr.bf16.vlgmr.msra.gmra.mxu0 %v264_v63 }
 0x19e   :  { %665 = vmatprep.mubr.msk.bf16.mxu0 %vm743_vm0, %v742_v2 }
 0x25d   :  { %v639_v3 = vpop.f32.mrf.mxu0 }
 0x25f   :  { %v640_v5 = vpop.f32.mrf.mxu0 }
 0x260   :  { %v641_v6 = vadd.f32 %v640_v5, %v639_v3 }
 0x261   :  { %v642_v7 = vpop.f32.mrf.mxu0 }
 0x262   :  { %v436_v8 = vadd.f32 %v641_v6, %v600_v4 }
 0x263   :  { %v643_v9 = vpop.f32.mrf.mxu0 }
 0x264   :  { %v441_v10 = vmax.f32 %v436_v8, 0.0 }
 0x266   :  { %v442_v2 = vpack.c.bf16 %v441_v10, %v441_v10 }
 0x268   :  { %v455_v11 = vsel %vm450_vm2, %v442_v2, 0 }
 0x269   :  { %658 = vmatpush3.bf16.xpose.msra.mxu1 %v455_v11 }
 0x270   :  { %660 = vmatmul.mubr.msk.bf16.vlgmr.msra.gmra.mxu1 %vm450_vm2, %v443_v12 }
 0x330   :  { %v491_v14 = vpop.f32.mrf.mxu1 }
 0x331   :  { %v492_v15 = vadd.f32 %v491_v14, %v448_v13 }
 0x332   :  { %v661_v16 = vpop.f32.mrf.mxu1 }
 0x333   :  { %v497_v17 = vmax.f32 %v492_v15, 0.0 }
 0x334   :  { %v494_v18 = vpop.f32.mrf.mxu1 }
 0x335   :  { %v498_v19 = vpack.c.bf16 %v497_v17, %v497_v17 }
 0x336   :  { %v662_v20 = vpop.f32.mrf.mxu1 }
 0x337   :  { %v516_v21 = vsel %vm514_vm3, %v498_v19, 0 }
 0x338   :  { %664 = vmatpush3.bf16.msra.mxu0 %v516_v21 }
 0x33b   :  { %666 = vmatmul.mubr.msk.bf16.vlgmr.msra.gmra.mxu0 %vm510_vm4, %v499_v22 }
 0x3fb   :  { %v552_v25 = vpop.f32.mrf.mxu0 }
 0x3fc   :  { %v553_v26 = vadd.f32 %v552_v25, %v509_v24 }
 0x3fd   :  { %v667_v27 = vpop.f32.mrf.mxu0 }
 0x3fe   :  { %v619_v28 = vmul.f32 -1.442695, %v553_v26 }
 0x3ff   :  { %v555_v29 = vpop.f32.mrf.mxu0 }
 0x400   :  { %716 = vpow2.f32 %v619_v28 }
 0x401   :  { %v668_v30 = vpop.f32.mrf.mxu0 }
 0x40d   :  { %v717_v31 = vpop.eup %716 }
 0x40e   :  { %v561_v32 = vadd.f32 1.0, %v717_v31 }
 0x410   :  { %718 = vrcp.f32 %v561_v32 }
 0x41d   :  { %v719_v33 = vpop.eup %718 }
 0x41e   :  { %565 = vst.msk [vmem:[#allocation3] sm:$0x1] %vm564_vm5, %v719_v33 }
 0x41f   :  { %731 = shalt.err (!%p728_p4)
}
 0x420   :  { %575 = dma.vmem_to_hbm [thread:$0]  %s573_s27, 16, %s956_s11, [#allocation4]  }
 0x421   :  { %740 = dma.done.wait [#allocation4], 16  }
 0x422   :  { %741 = vsyncadd [#allocation4], 4294967280 }
 0x423   :  { %579 = vsyncpa [#allocation4], 1 }

</bundles_post_ra>
